<compile_context>
chip_gen: v5e
topology: v5e:2x2
jax: 0.10.0
libtpu: 0.0.40
codegen_flags: <defaults>
</compile_context>

<pallas_src>
import jax
import jax.numpy as jnp
from jax import lax
from jax.experimental import pallas as pl
from jax.experimental.pallas import tpu as pltpu

# ---- problem sizes (small, deterministic) ----
H = 32          # hidden_size
MID = 64        # mid_size
C = 16          # num_class
N_NODES = 8     # number of graph nodes in the demo graph

PAD = 128       # lane width; every weight slot is stored 128 lanes wide (zero padded)

# ---- packed bf16 parameter slab: row offsets (all 8-aligned) ----
OFF_W1A = 0                  # node_to_edge layer-1 weight (2H, MID) -> rows [  0,  64)
OFF_W2A = OFF_W1A + 2 * H    # node_to_edge layer-2 weight (MID, H)  -> rows [ 64, 128)
OFF_W1C = OFF_W2A + MID      # classifier   layer-1 weight (H, MID)  -> rows [128, 160)
OFF_W2C = OFF_W1C + H        # classifier   layer-2 weight (MID, C)  -> rows [160, 224)
OFF_BIAS = OFF_W2C + MID     # 8-row bias slot: +0=b1a, +1=b2a, +2=b1c, +3=b2c
TOTAL_ROWS = OFF_BIAS + 8    # 232 rows * 128 lanes * 2 B ~= 58 KiB (single resident DMA)
SLAB_BYTES = TOTAL_ROWS * PAD * 2

ROW_BLOCK = 512              # max activation rows per grid step (all-nodes branch)


def _bf16(x):
    return x.astype(jnp.bfloat16)


def _f32(x):
    return x.astype(jnp.float32)


def _classifier(x, params_ref, bias_blk):
    """ans_classifier (Linear -> ReLU -> Linear) on an f32 activation block.

    x: (rows, >=H) f32, real features in lanes [0, H).
    Returns (rows, 128) f32 with logits in lanes [0, C).  MXU operands bf16, f32 epilogue.
    """
    w1 = params_ref[OFF_W1C:OFF_W1C + H, :]        # (H, 128) bf16
    w2 = params_ref[OFF_W2C:OFF_W2C + MID, :]      # (MID, 128) bf16
    z = jnp.dot(_bf16(x[:, :H]), w1, preferred_element_type=jnp.float32)
    z = jnp.maximum(z + bias_blk[2:3, :], 0.0)     # (rows, 128), real lanes [0, MID)
    out = jnp.dot(_bf16(z[:, :MID]), w2, preferred_element_type=jnp.float32)
    return out + bias_blk[3:4, :]                  # real lanes [0, C)


def _edge_kernel(ids_ref, node_ref, params_ref, out_ref):
    """One (pre_node_1, pre_node_2) pair per grid step (grid amortizes launch + weight DMA).

    ids_ref   : SMEM (B, 2) int32 (scalar prefetch)
    node_ref  : VMEM (N, H) f32          -- resident (same block every step)
    params_ref: VMEM (TOTAL_ROWS, 128) bf16 -- resident
    out_ref   : VMEM (1, 128) f32 block of the (B, 1, 128) output
    """
    b = pl.program_id(0)
    i1 = ids_ref[b, 0]
    i2 = ids_ref[b, 1]

    nodes = _f32(node_ref[...])                                    # (N, H)
    n = nodes.shape[0]
    bias_blk = _f32(params_ref[OFF_BIAS:OFF_BIAS + 8, :])          # (8, 128)

    # In-kernel gather of the two node rows (replaces wrapper-side indexing/concat):
    # one-hot masked sum over the sublane axis -> (1, H) each.
    row_ids = lax.broadcasted_iota(jnp.int32, (n, 1), 0)
    r1 = jnp.sum(jnp.where(row_ids == i1, nodes, 0.0), axis=0, keepdims=True)
    r2 = jnp.sum(jnp.where(row_ids == i2, nodes, 0.0), axis=0, keepdims=True)

    # node_to_edge_linear layer 1:  concat([r1, r2]) @ W1 == r1 @ W1[:H] + r2 @ W1[H:]
    w1_top = params_ref[OFF_W1A:OFF_W1A + H, :]                    # (H, 128) bf16
    w1_bot = params_ref[OFF_W1A + H:OFF_W1A + 2 * H, :]            # (H, 128) bf16
    h = (jnp.dot(_bf16(r1), w1_top, preferred_element_type=jnp.float32)
         + jnp.dot(_bf16(r2), w1_bot, preferred_element_type=jnp.float32)
         + bias_blk[0:1, :])
    h = jnp.maximum(h, 0.0)                                        # (1, 128), lanes [0, MID)

    # node_to_edge_linear layer 2.
    w2 = params_ref[OFF_W2A:OFF_W2A + MID, :]                      # (MID, 128) bf16
    e = jnp.dot(_bf16(h[:, :MID]), w2, preferred_element_type=jnp.float32)
    e = e + bias_blk[1:2, :]                                       # (1, 128), lanes [0, H)

    out_ref[...] = _classifier(e, params_ref, bias_blk)


def _nodes_kernel(node_ref, params_ref, out_ref):
    """Classify a block of node rows. node_ref: (rows, H) f32; out_ref: (rows, 128) f32."""
    bias_blk = _f32(params_ref[OFF_BIAS:OFF_BIAS + 8, :])
    out_ref[...] = _classifier(_f32(node_ref[...]), params_ref, bias_blk)


@jax.jit
def _edge_forward(ids, node_feats, slab):
    b = ids.shape[0]
    n, h = node_feats.shape
    cost = pl.CostEstimate(
        flops=int(b * 2 * (2 * n * h + 2 * H * PAD + MID * PAD + H * PAD + MID * PAD)),
        transcendentals=0,
        bytes_accessed=int(SLAB_BYTES + n * h * 4 + b * (2 * 4 + PAD * 4)))
    out = pl.pallas_call(
        _edge_kernel,
        out_shape=jax.ShapeDtypeStruct((b, 1, PAD), jnp.float32),
        grid_spec=pltpu.PrefetchScalarGridSpec(
            num_scalar_prefetch=1,
            grid=(b,),
            in_specs=[
                pl.BlockSpec((n, h), lambda i, ids_ref: (0, 0)),               # resident
                pl.BlockSpec((TOTAL_ROWS, PAD), lambda i, ids_ref: (0, 0)),    # resident
            ],
            out_specs=pl.BlockSpec((None, 1, PAD), lambda i, ids_ref: (i, 0, 0)),
        ),
        compiler_params=pltpu.CompilerParams(dimension_semantics=("parallel",)),
        cost_estimate=cost,
    )(ids, node_feats, slab)
    return out[:, 0, :C]                                           # (B, C)


@jax.jit
def _nodes_forward(node_feats, slab):
    n, h = node_feats.shape
    block_rows = max(8, min(ROW_BLOCK, -(-n // 8) * 8))            # biggest block that fits
    cost = pl.CostEstimate(
        flops=int(n * 2 * (H * PAD + MID * PAD)),
        transcendentals=0,
        bytes_accessed=int(SLAB_BYTES + n * h * 4 + n * PAD * 4))
    out = pl.pallas_call(
        _nodes_kernel,
        out_shape=jax.ShapeDtypeStruct((n, PAD), jnp.float32),
        grid_spec=pltpu.PrefetchScalarGridSpec(
            num_scalar_prefetch=0,
            grid=(pl.cdiv(n, block_rows),),
            in_specs=[
                pl.BlockSpec((block_rows, h), lambda i: (i, 0)),
                pl.BlockSpec((TOTAL_ROWS, PAD), lambda i: (0, 0)),             # resident
            ],
            out_specs=pl.BlockSpec((block_rows, PAD), lambda i: (i, 0)),
        ),
        compiler_params=pltpu.CompilerParams(dimension_semantics=("parallel",)),
        cost_estimate=cost,
    )(node_feats, slab)
    return out[:n, :C]                                             # (N, C)


def reason_forward(node_feats, pre_node_ids, slab):
    """Matches Reason.forward: the branch is decided host-side (like `.item()` in PyTorch)."""
    if len(pre_node_ids) > 1:
        ids = jnp.asarray([pre_node_ids[0]], dtype=jnp.int32)      # only the first pair is used
        return _edge_forward(ids, node_feats, slab)                # (1, C)
    return _nodes_forward(node_feats, slab)                        # (N, C)


def pack_params(params):
    """Pack all weights/biases into one tightly packed (TOTAL_ROWS, 128) bf16 slab."""
    w1a, b1a, w2a, b2a, w1c, b1c, w2c, b2c = params
    slab = jnp.zeros((TOTAL_ROWS, PAD), jnp.float32)

    def put(s, off, arr):
        return s.at[off:off + arr.shape[0], :arr.shape[1]].set(arr)

    slab = put(slab, OFF_W1A, w1a)
    slab = put(slab, OFF_W2A, w2a)
    slab = put(slab, OFF_W1C, w1c)
    slab = put(slab, OFF_W2C, w2c)
    slab = put(slab, OFF_BIAS + 0, b1a)
    slab = put(slab, OFF_BIAS + 1, b2a)
    slab = put(slab, OFF_BIAS + 2, b1c)
    slab = put(slab, OFF_BIAS + 3, b2c)
    return slab.astype(jnp.bfloat16)


# ---- pure-JAX f32 reference for correctness checking ----
def reason_reference(node_feats, pre_node_ids, params):
    w1a, b1a, w2a, b2a, w1c, b1c, w2c, b2c = params

    def mlp(x, w1, b1, w2, b2):
        return jnp.maximum(x @ w1 + b1, 0.0) @ w2 + b2

    if len(pre_node_ids) > 1:
        i1, i2 = pre_node_ids[0]
        x = jnp.concatenate([node_feats[i1:i1 + 1, :], node_feats[i2:i2 + 1, :]], axis=1)
        out = mlp(x, w1a, b1a, w2a, b2a)
    else:
        out = node_feats
    return mlp(out, w1c, b1c, w2c, b2c)


def init_params(key):
    ks = jax.random.split(key, 8)

    def lin(kw, kb, in_s, out_s):
        w = jax.random.normal(kw, (in_s, out_s), jnp.float32) * 0.1
        b = jax.random.normal(kb, (1, out_s), jnp.float32) * 0.1
        return w, b

    w1a, b1a = lin(ks[0], ks[1], 2 * H, MID)   # node_to_edge_linear layer 1
    w2a, b2a = lin(ks[2], ks[3], MID, H)       # node_to_edge_linear layer 2
    w1c, b1c = lin(ks[4], ks[5], H, MID)       # ans_classifier layer 1
    w2c, b2c = lin(ks[6], ks[7], MID, C)       # ans_classifier layer 2
    return (w1a, b1a, w2a, b2a, w1c, b1c, w2c, b2c)


if __name__ == "__main__":
    root = jax.random.PRNGKey(0)
    k_feat, k_par = jax.random.split(root, 2)

    node_feats = jax.random.normal(k_feat, (N_NODES, H), jnp.float32)
    params = init_params(k_par)
    slab = pack_params(params)

    # Tolerance accommodates bf16 MXU-operand storage/compute (expected abs err ~1e-3..1e-2).
    RTOL = ATOL = 3e-2

    # Branch 1: multiple pre_node_ids -> cat two node features, edge MLP, classifier.
    pre_ids_multi = [(1, 3), (0, 2)]
    out_edge = jax.block_until_ready(reason_forward(node_feats, pre_ids_multi, slab))
    ref_edge = reason_reference(node_feats, pre_ids_multi, params)
    assert out_edge.shape == (1, C)
    assert jnp.allclose(out_edge, ref_edge, rtol=RTOL, atol=ATOL)

    # Branch 2: single pre_node_id entry -> classify every graph node.
    pre_ids_single = [(1, 3)]
    out_nodes = jax.block_until_ready(reason_forward(node_feats, pre_ids_single, slab))
    ref_nodes = reason_reference(node_feats, pre_ids_single, params)
    assert out_nodes.shape == (N_NODES, C)
    assert jnp.allclose(out_nodes, ref_nodes, rtol=RTOL, atol=ATOL)

    print("KERNEL_OK")
</pallas_src>

<mosaic_0001>
module attributes {stable_mosaic.version = 11 : i64} {
  func.func @_edge_kernel(%arg0: i32, %arg1: memref<1x2xi32, #tpu.memory_space<smem>>, %arg2: memref<8x32xf32, #tpu.memory_space<vmem>>, %arg3: memref<232x128xbf16, #tpu.memory_space<vmem>>, %arg4: memref<1x1x128xf32, #tpu.memory_space<vmem>>) attributes {dimension_semantics = [#tpu.dimension_semantics<parallel>], iteration_bounds = array<i64: 1>, scalar_prefetch = 1 : i64, scratch_operands = 0 : i64, tpu.core_type = #tpu.core_type<tc>, window_params = [{pipeline_mode = #tpu.pipeline_mode<synchronous>, transform_indices = @transform_0, window_bounds = array<i64: 8, 32>}, {pipeline_mode = #tpu.pipeline_mode<synchronous>, transform_indices = @transform_1, window_bounds = array<i64: 232, 128>}, {transform_indices = @transform_2, window_bounds = array<i64: 1, 1, 128>}]} {
    %0 = arith.index_cast %arg0 : i32 to index
    %c0 = arith.constant 0 : index
    %1 = memref.load %arg1[%0, %c0] : memref<1x2xi32, #tpu.memory_space<smem>>
    %2 = arith.index_cast %arg0 : i32 to index
    %c1 = arith.constant 1 : index
    %3 = memref.load %arg1[%2, %c1] : memref<1x2xi32, #tpu.memory_space<smem>>
    %c0_0 = arith.constant 0 : index
    %c0_1 = arith.constant 0 : index
    %4 = vector.load %arg2[%c0_0, %c0_1] : memref<8x32xf32, #tpu.memory_space<vmem>>, vector<8x32xf32>
    %c224 = arith.constant 224 : index
    %c0_2 = arith.constant 0 : index
    %5 = vector.load %arg3[%c224, %c0_2] : memref<232x128xbf16, #tpu.memory_space<vmem>>, vector<8x128xbf16>
    %6 = arith.extf %5 : vector<8x128xbf16> to vector<8x128xf32>
    %7 = tpu.iota {dimensions = array<i32: 0>} : vector<8x1xi32>
    %8 = vector.broadcast %1 : i32 to vector<8x1xi32>
    %9 = arith.cmpi eq, %7, %8 : vector<8x1xi32>
    %cst = arith.constant 0.000000e+00 : f32
    %10 = vector.shape_cast %9 : vector<8x1xi1> to vector<8x1xi1>
    %11 = vector.broadcast %10 : vector<8x1xi1> to vector<8x32xi1>
    %12 = vector.broadcast %cst : f32 to vector<8x32xf32>
    %13 = arith.select %11, %4, %12 : vector<8x32xi1>, vector<8x32xf32>
    %cst_3 = arith.constant dense<0.000000e+00> : vector<32xf32>
    %14 = vector.multi_reduction <add>, %13, %cst_3 [0] : vector<8x32xf32> to vector<32xf32>
    %15 = vector.shape_cast %14 : vector<32xf32> to vector<1x32xf32>
    %16 = vector.broadcast %3 : i32 to vector<8x1xi32>
    %17 = arith.cmpi eq, %7, %16 : vector<8x1xi32>
    %cst_4 = arith.constant 0.000000e+00 : f32
    %18 = vector.shape_cast %17 : vector<8x1xi1> to vector<8x1xi1>
    %19 = vector.broadcast %18 : vector<8x1xi1> to vector<8x32xi1>
    %20 = vector.broadcast %cst_4 : f32 to vector<8x32xf32>
    %21 = arith.select %19, %4, %20 : vector<8x32xi1>, vector<8x32xf32>
    %cst_5 = arith.constant dense<0.000000e+00> : vector<32xf32>
    %22 = vector.multi_reduction <add>, %21, %cst_5 [0] : vector<8x32xf32> to vector<32xf32>
    %23 = vector.shape_cast %22 : vector<32xf32> to vector<1x32xf32>
    %c0_6 = arith.constant 0 : index
    %c0_7 = arith.constant 0 : index
    %24 = vector.load %arg3[%c0_6, %c0_7] : memref<232x128xbf16, #tpu.memory_space<vmem>>, vector<32x128xbf16>
    %c32 = arith.constant 32 : index
    %c0_8 = arith.constant 0 : index
    %25 = vector.load %arg3[%c32, %c0_8] : memref<232x128xbf16, #tpu.memory_space<vmem>>, vector<32x128xbf16>
    %26 = arith.truncf %15 : vector<1x32xf32> to vector<1x32xbf16>
    %cst_9 = arith.constant dense<0.000000e+00> : vector<1x128xf32>
    %27 = tpu.matmul %26, %24, %cst_9 {dimension_numbers = #tpu.dot_dimension_numbers<[1], [0], [0], [1], [0, 0, 1, 1], [], []>} : vector<1x32xbf16>, vector<32x128xbf16>, vector<1x128xf32> -> vector<1x128xf32>
    %28 = arith.truncf %23 : vector<1x32xf32> to vector<1x32xbf16>
    %cst_10 = arith.constant dense<0.000000e+00> : vector<1x128xf32>
    %29 = tpu.matmul %28, %25, %cst_10 {dimension_numbers = #tpu.dot_dimension_numbers<[1], [0], [0], [1], [0, 0, 1, 1], [], []>} : vector<1x32xbf16>, vector<32x128xbf16>, vector<1x128xf32> -> vector<1x128xf32>
    %30 = arith.addf %27, %29 : vector<1x128xf32>
    %31 = vector.extract_strided_slice %6 {offsets = [0, 0], sizes = [1, 128], strides = [1, 1]} : vector<8x128xf32> to vector<1x128xf32>
    %32 = arith.addf %30, %31 : vector<1x128xf32>
    %cst_11 = arith.constant 0.000000e+00 : f32
    %33 = vector.broadcast %cst_11 : f32 to vector<1x128xf32>
    %34 = arith.maximumf %32, %33 : vector<1x128xf32>
    %c64 = arith.constant 64 : index
    %c0_12 = arith.constant 0 : index
    %35 = vector.load %arg3[%c64, %c0_12] : memref<232x128xbf16, #tpu.memory_space<vmem>>, vector<64x128xbf16>
    %36 = vector.extract_strided_slice %34 {offsets = [0, 0], sizes = [1, 64], strides = [1, 1]} : vector<1x128xf32> to vector<1x64xf32>
    %37 = arith.truncf %36 : vector<1x64xf32> to vector<1x64xbf16>
    %cst_13 = arith.constant dense<0.000000e+00> : vector<1x128xf32>
    %38 = tpu.matmul %37, %35, %cst_13 {dimension_numbers = #tpu.dot_dimension_numbers<[1], [0], [0], [1], [0, 0, 1, 1], [], []>} : vector<1x64xbf16>, vector<64x128xbf16>, vector<1x128xf32> -> vector<1x128xf32>
    %39 = vector.extract_strided_slice %6 {offsets = [1, 0], sizes = [1, 128], strides = [1, 1]} : vector<8x128xf32> to vector<1x128xf32>
    %40 = arith.addf %38, %39 : vector<1x128xf32>
    %c128 = arith.constant 128 : index
    %c0_14 = arith.constant 0 : index
    %41 = vector.load %arg3[%c128, %c0_14] : memref<232x128xbf16, #tpu.memory_space<vmem>>, vector<32x128xbf16>
    %c160 = arith.constant 160 : index
    %c0_15 = arith.constant 0 : index
    %42 = vector.load %arg3[%c160, %c0_15] : memref<232x128xbf16, #tpu.memory_space<vmem>>, vector<64x128xbf16>
    %43 = vector.extract_strided_slice %40 {offsets = [0, 0], sizes = [1, 32], strides = [1, 1]} : vector<1x128xf32> to vector<1x32xf32>
    %44 = arith.truncf %43 : vector<1x32xf32> to vector<1x32xbf16>
    %cst_16 = arith.constant dense<0.000000e+00> : vector<1x128xf32>
    %45 = tpu.matmul %44, %41, %cst_16 {dimension_numbers = #tpu.dot_dimension_numbers<[1], [0], [0], [1], [0, 0, 1, 1], [], []>} : vector<1x32xbf16>, vector<32x128xbf16>, vector<1x128xf32> -> vector<1x128xf32>
    %46 = vector.extract_strided_slice %6 {offsets = [2, 0], sizes = [1, 128], strides = [1, 1]} : vector<8x128xf32> to vector<1x128xf32>
    %47 = arith.addf %45, %46 : vector<1x128xf32>
    %cst_17 = arith.constant 0.000000e+00 : f32
    %48 = vector.broadcast %cst_17 : f32 to vector<1x128xf32>
    %49 = arith.maximumf %47, %48 : vector<1x128xf32>
    %50 = vector.extract_strided_slice %49 {offsets = [0, 0], sizes = [1, 64], strides = [1, 1]} : vector<1x128xf32> to vector<1x64xf32>
    %51 = arith.truncf %50 : vector<1x64xf32> to vector<1x64xbf16>
    %cst_18 = arith.constant dense<0.000000e+00> : vector<1x128xf32>
    %52 = tpu.matmul %51, %42, %cst_18 {dimension_numbers = #tpu.dot_dimension_numbers<[1], [0], [0], [1], [0, 0, 1, 1], [], []>} : vector<1x64xbf16>, vector<64x128xbf16>, vector<1x128xf32> -> vector<1x128xf32>
    %53 = vector.extract_strided_slice %6 {offsets = [3, 0], sizes = [1, 128], strides = [1, 1]} : vector<8x128xf32> to vector<1x128xf32>
    %54 = arith.addf %52, %53 : vector<1x128xf32>
    %c0_19 = arith.constant 0 : index
    %c0_20 = arith.constant 0 : index
    %c0_21 = arith.constant 0 : index
    %55 = vector.load %arg4[%c0_19, %c0_20, %c0_21] : memref<1x1x128xf32, #tpu.memory_space<vmem>>, vector<1x1x128xf32>
    %56 = vector.shape_cast %55 : vector<1x1x128xf32> to vector<1x128xf32>
    %57 = vector.shape_cast %54 : vector<1x128xf32> to vector<1x1x128xf32>
    tpu.vector_store %arg4[%c0_19, %c0_20, %c0_21], %57 {strides = array<i32>} : memref<1x1x128xf32, #tpu.memory_space<vmem>>, vector<1x1x128xf32>,
    return
  }
  func.func @transform_0(%arg0: i32, %arg1: memref<1x2xi32, #tpu.memory_space<smem>>) -> (i32, i32) {
    %c0_i32 = arith.constant 0 : i32
    %c0_i32_0 = arith.constant 0 : i32
    %c0_i32_1 = arith.constant 0 : i32
    return %c0_i32, %c0_i32_0 : i32, i32
  }
  func.func @transform_1(%arg0: i32, %arg1: memref<1x2xi32, #tpu.memory_space<smem>>) -> (i32, i32) {
    %c0_i32 = arith.constant 0 : i32
    %c0_i32_0 = arith.constant 0 : i32
    %c0_i32_1 = arith.constant 0 : i32
    return %c0_i32, %c0_i32_0 : i32, i32
  }
  func.func @transform_2(%arg0: i32, %arg1: memref<1x2xi32, #tpu.memory_space<smem>>) -> (i32, i32, i32) {
    %c0_i32 = arith.constant 0 : i32
    %c0_i32_0 = arith.constant 0 : i32
    %c0_i32_1 = arith.constant 0 : i32
    return %arg0, %c0_i32, %c0_i32_0 : i32, i32, i32
  }
}

</mosaic_0001>

<bundles_post_ra>
// kernel: _edge_forward.1
= control target key start
LH: loop header
LB: loop body
LE: loop exit
PB: predicated region body
PF: predicated region fallthrough
CT: control target
= control target key end

     0   :  { %s447_s15 = smov [#allocation3]   ;;  %s491_s0 = inlined_call_operand.hbm [shape: s32[1,2], index: 0, kind: input, shape index: {}]   ;;  %s492_s1 = inlined_call_operand.hbm [shape: f32[8,32], index: 1, kind: input, shape index: {}]   ;;  %s493_s2 = inlined_call_operand.hbm [shape: bf16[232,128], index: 2, kind: input, shape index: {}]   ;;  %s494_s3 = inlined_call_operand.vmem [shape: f32[1,1,128], index: 3, kind: output, shape index: {}]  }
   0x1   :  { %s9_s14 = sshll.u32 %s491_s0, 4  ;;  %s10_s14 = int_to_ptr.hbm [resolvable:$true] %s9_s14 }
   0x2   :  { %12 = dma.hbm_to_smem %s10_s14, 16, %s447_s15, [#allocation2] }
   0x3   :  { %441 = dma.done.wait [#allocation2], 16 }
   0x4   :  { %442 = vsyncadd [#allocation2], 4294967280 }
   0x5   :  { %15 = sfence }
   0x6   :  { %16 = vsyncpa [#allocation5], 0  ;;  %s23_s18 = sshll.u32 %s492_s1, 4  ;;  %s24_s18 = int_to_ptr.hbm [resolvable:$true] %s23_s18 }
   0x7   :  { %17 = vsyncpa [#allocation7], 0  ;;  %s448_s19 = smov [#allocation4]   ;;  %s33_s0 = sshll.u32 %s493_s2, 4  ;;  %s34_s0 = int_to_ptr.hbm [resolvable:$true] %s33_s0 }
   0x8   :  { %s25_s20 = sshll.u32 %s448_s19, 4  ;;  %s449_s23 = smov [#allocation6]   ;;  %s26_s20 = int_to_ptr.vmem [resolvable:$true] %s25_s20 }
   0x9   :  { %28 = dma.hbm_to_vmem [thread:$0]  %s24_s18, 128, %s26_s20, [#allocation5]  }
   0xa   :  { %s35_s24 = sshll.u32 %s449_s23, 4  ;;  %s450_s25 = smov 64   ;;  %s36_s24 = int_to_ptr.vmem [resolvable:$true] %s35_s24 }
   0xb   :  { %s451_s26 = smov 4  }
   0xc   :  { %41 = dma.hbm_to_vmem [thread:$0]  %s34_s0, 1856, %s36_s24, [#allocation7], %s450_s25, %s450_s25, %s451_s26  }
   0xd   :  { %443 = dma.done.wait [#allocation5], 128  }
   0xe   :  { %444 = vsyncadd [#allocation5], 4294967168 }
   0xf   :  { %445 = dma.done.wait [#allocation7], 1856  }
  0x10   :  { %446 = vsyncadd [#allocation7], 4294965440  ;;  %v58_v0 = vlaneseq  ;;  %s300_s1 = sld [smem:[#allocation3 + $0x1]]  ;;  %v365_v2 = vld [vmem:[#allocation6 + $0x18] sm:$0xff]  ;;  %v363_v3 = vld [vmem:[#allocation6 + $0x8] sm:$0xff]  ;;  %vm65_vm0 = vcmask 261120  }
  0x11   :  { %s52_s27 = sld [smem:[#allocation3]]  ;;  %v55_v5 = vld [vmem:[#allocation4] sm:$0xff]  ;;  %116 = vmatpush.bf16.msra.mxu0 %v365_v2  ;;  %144 = vmatpush.bf16.msra.mxu1 %v363_v3  ;;  %v364_v8 = vld [vmem:[#allocation6 + $0x10] sm:$0xff]  ;;  %v362_v9 = vld [vmem:[#allocation6] sm:$0xff]  ;;  %vm189_vm3 = vcmask 523264  }
  0x12   :  { %v59_v1 = vshrl.u32 %v58_v0, 7  ;;  %v369_v7 = vld [vmem:[#allocation6 + $0x38] sm:$0xff]  ;;  %v368_v13 = vld [vmem:[#allocation6 + $0x30] sm:$0xff]  ;;  %v367_v29 = vld [vmem:[#allocation6 + $0x28] sm:$0xff] }
  0x13   :  { %197 = vmatpush.bf16.msra.mxu2 %v369_v7  ;;  %v366_v30 = vld [vmem:[#allocation6 + $0x20] sm:$0xff]  ;;  %v371_v31 = vld [vmem:[#allocation6 + $0x48] sm:$0xff]  ;;  %v56_v32 = vld [vmem:[#allocation6 + $0x70] sm:$0xf] }
  0x14   :  { %242 = vmatpush.bf16.msra.mxu3 %v371_v31  ;;  %v57_v34 = vunpack.c.l.bf16 %v56_v32  ;;  %v370_v42 = vld [vmem:[#allocation6 + $0x40] sm:$0xff]  ;;  %v375_v43 = vld [vmem:[#allocation6 + $0x68] sm:$0xff]  ;;  %v373_v45 = vld [vmem:[#allocation6 + $0x58] sm:$0xff] }
  0x15   :  { %117 = vmatpush.bf16.msra.mxu0 %v364_v8  ;;  %145 = vmatpush.bf16.msra.mxu1 %v362_v9  ;;  %v374_v44 = vld [vmem:[#allocation6 + $0x60] sm:$0xff]  ;;  %v372_v51 = vld [vmem:[#allocation6 + $0x50] sm:$0xff] }
  0x16   :  { %v73_v4 = vstv %s300_s1  ;;  %v187_v46 = vrot.slane %v57_v34, 1  ;;  %v231_v52 = vrot.slane %v57_v34, 2  ;;  %v275_v58 = vrot.slane %v57_v34, 3 }
  0x17   :  { %vm74_vm1 = vcmp.eq.s32.totalorder %v59_v1, %v73_v4  ;;  %v60_v6 = vstv %s52_s27  ;;  %198 = vmatpush.bf16.msra.mxu2 %v368_v13 }
  0x18   :  { %v77_v10 = vsel %vm74_vm1, %v55_v5, 0.0  ;;  %vm61_vm2 = vcmp.eq.s32.totalorder %v59_v1, %v60_v6  ;;  %243 = vmatpush.bf16.msra.mxu3 %v370_v42 }
  0x19   :  { %v78_v11 = vsel %vm65_vm0, %v77_v10, 0.0  ;;  %v64_v12 = vsel %vm61_vm2, %v55_v5, 0.0  ;;  %284 = vmatpush.bf16.msrb.mxu0 %v375_v43 }
  0x1a   :  { %v79_v14 = vrot.slane %v78_v11, 4  ;;  %v66_v15 = vsel %vm65_vm0, %v64_v12, 0.0 }
  0x1b   :  { %v67_v16 = vrot.slane %v66_v15, 4  ;;  %199 = vmatpush.bf16.msra.mxu2 %v367_v29 }
  0x1c   :  { %v80_v17 = vadd.f32 %v79_v14, %v78_v11 }
  0x1d   :  { %v68_v18 = vadd.f32 %v67_v16, %v66_v15  ;;  %285 = vmatpush.bf16.msrb.mxu0 %v374_v44 }
  0x1e   :  { %v81_v19 = vrot.slane %v80_v17, 2 }
  0x1f   :  { %v69_v20 = vrot.slane %v68_v18, 2  ;;  %200 = vmatpush.bf16.msra.mxu2 %v366_v30 }
  0x20   :  { %v82_v21 = vadd.f32 %v81_v19, %v80_v17 }
  0x21   :  { %v70_v22 = vadd.f32 %v69_v20, %v68_v18  ;;  %286 = vmatpush.bf16.msrb.mxu0 %v373_v45 }
  0x22   :  { %v83_v23 = vrot.slane %v82_v21, 1 }
  0x23   :  { %v71_v24 = vrot.slane %v70_v22, 1 }
  0x24   :  { %v84_v25 = vadd.f32 %v83_v23, %v82_v21 }
  0x25   :  { %v72_v26 = vadd.f32 %v71_v24, %v70_v22  ;;  %287 = vmatpush.bf16.msrb.mxu0 %v372_v51 }
  0x26   :  { %v94_v27 = vpack.c.bf16 %v84_v25, %v84_v25 }
  0x27   :  { %v93_v28 = vpack.c.bf16 %v72_v26, %v72_v26 }
  0x28   :  { %309 = vmatmul.msk.bf16.vlgmr.msra.gmra.mxu0 %vm65_vm0, %v94_v27 }
  0x29   :  { %318 = vmatmul.msk.bf16.vlgmr.msra.gmra.mxu1 %vm65_vm0, %v93_v28 }
  0xa5   :  { %v119_v33 = vpop.f32.mrf.mxu0 }
  0xa6   :  { %v147_v35 = vpop.f32.mrf.mxu1 }
  0xa7   :  { %v148_v36 = vadd.f32 %v147_v35, %v119_v33 }
  0xa9   :  { %v151_v37 = vadd.f32 %v148_v36, %v57_v34 }
  0xab   :  { %v152_v38 = vmax.f32 %v151_v37, 0.0 }
  0xad   :  { %v161_v39 = vpack.c.bf16 %v152_v38, %v152_v38  ;;  %v121_v40 = vpop.f32.mrf.mxu0 }
  0xae   :  { %v149_v41 = vpop.f32.mrf.mxu1 }
  0xaf   :  { %335 = vmatmul.msk.bf16.vlgmr.msra.gmra.mxu2 %vm189_vm3, %v161_v39 }
 0x132   :  { %v202_v47 = vpop.f32.mrf.mxu2 }
 0x133   :  { %v203_v48 = vadd.f32 %v202_v47, %v187_v46 }
 0x135   :  { %v218_v49 = vpack.c.bf16 %v203_v48, %v203_v48 }
 0x137   :  { %344 = vmatmul.msk.bf16.vlgmr.msra.gmra.mxu3 %vm65_vm0, %v218_v49 }
 0x13a   :  { %v204_v50 = vpop.f32.mrf.mxu2 }
 0x1ba   :  { %v245_v53 = vpop.f32.mrf.mxu3 }
 0x1bb   :  { %v246_v54 = vadd.f32 %v245_v53, %v231_v52 }
 0x1bd   :  { %v249_v55 = vmax.f32 %v246_v54, 0.0 }
 0x1bf   :  { %v250_v56 = vpack.c.bf16 %v249_v55, %v249_v55 }
 0x1c1   :  { %361 = vmatmul.msk.bf16.vlgmr.msrb.gmra.mxu0 %vm189_vm3, %v250_v56 }
 0x1c2   :  { %v247_v57 = vpop.f32.mrf.mxu3 }
 0x23e   :  { %v289_v59 = vpop.f32.mrf.mxu0 }
 0x23f   :  { %v290_v60 = vadd.f32 %v289_v59, %v275_v58 }
 0x241   :  { %293 = vst [vmem:[%s494_s3] sm:$0x1] %v290_v60 }
 0x246   :  { %v291_v61 = vpop.f32.mrf.mxu0 }
 0x247   :  { %298 = vsyncpa [#allocation5], 1 }
 0x248   :  { %299 = vsyncpa [#allocation7], 1 }

</bundles_post_ra>
